<compile_context>
chip_gen: v7x
topology: tpu7x:2x2x1
jax: 0.10.0
libtpu: 0.0.40
codegen_flags: <defaults>
</compile_context>

<pallas_src>
import functools

import jax
import jax.numpy as jnp
from jax.experimental import pallas as pl
from jax.experimental.pallas import tpu as pltpu


def _bn_stats_kernel(x_ref, o_ref):
    """Per-channel sum and sum-of-squares, accumulated over the batch grid."""
    @pl.when(pl.program_id(0) == 0)
    def _init():
        o_ref[...] = jnp.zeros_like(o_ref)

    x = x_ref[0]                                        # (C, HW) f32
    s1 = jnp.sum(x, axis=1, keepdims=True)              # (C, 1)
    s2 = jnp.sum(x * x, axis=1, keepdims=True)          # (C, 1)
    o_ref[:, 0:1] = o_ref[:, 0:1] + s1
    o_ref[:, 1:2] = o_ref[:, 1:2] + s2


def _single_layer_kernel(x_ref, w_ref, scale_ref, bias_ref, srcmask_ref,
                         o_ref, copy_sem, *, H, W):
    C = x_ref.shape[1]
    Cout = w_ref.shape[0]
    HW = H * W
    # Zero-pad width for the flat-shift trick: >= W+1 and lane-tile aligned so
    # the concatenation below is pure tile stacking.
    PAD = ((W // 128) + 1) * 128

    # Identity channels: local VMEM->VMEM DMA, overlapped with the conv work.
    idcopy = pltpu.make_async_copy(x_ref, o_ref.at[:, 0:C, :], copy_sem)
    idcopy.start()

    x = x_ref[0]                                                  # (C, HW) f32
    # BatchNorm folded to per-channel affine, then ReLU (VPU, f32).
    z = jnp.maximum(x * scale_ref[...] + bias_ref[...], 0.0)      # (C, HW)

    # Source-side column masks (f32): z_l zeroes source column W-1 (valid for
    # ALL dx=-1 taps), z_r zeroes source column 0 (ALL dx=+1 taps).  Two
    # multiplies total instead of six per-tap mask multiplies.
    z_l = z * srcmask_ref[0:1, :]
    z_r = z * srcmask_ref[1:2, :]

    # Zero-extended copies for the flat-shift trick.  For tap (dy, dx) the
    # needed input z[h+dy, w+dx] sits at constant flat offset dy*W + dx; row
    # over/underflow lands in the zero pads, column wrap is removed because the
    # offending source column is already zeroed in the masked copy.
    zpad = jnp.zeros((C, PAD), dtype=jnp.float32)

    def ext(v):
        return jnp.concatenate([zpad, v, zpad], axis=1)           # (C, HW+2*PAD)

    ext_by_dx = {-1: ext(z_l), 0: ext(z), 1: ext(z_r)}

    # Stack the 9 shifted taps along the contraction dim -> ONE MXU matmul
    # with K = 9*C (bf16 operands, f32 accumulation).
    taps = []
    for k in range(9):
        dy, dx = k // 3 - 1, k % 3 - 1
        off = PAD + dy * W + dx
        taps.append(ext_by_dx[dx][:, off:off + HW])               # (C, HW)
    stacked = jnp.concatenate(taps, axis=0).astype(jnp.bfloat16)  # (9C, HW)

    acc = jnp.dot(w_ref[...], stacked,
                  preferred_element_type=jnp.float32)             # (Cout, HW)

    # Fused channel concat: first C channels arrive via the DMA above, the
    # remaining Cout channels are the conv output.
    o_ref[0, C:C + Cout, :] = acc.astype(o_ref.dtype)

    idcopy.wait()


def single_layer_forward(x_nchw, conv_w, gamma, beta, eps=1e-5):
    N, C, H, W = x_nchw.shape
    Cout = conv_w.shape[0]
    HW = H * W

    x_nchw = x_nchw.astype(jnp.float32)
    # NCHW-native flat layout: (N, C, H*W); reshapes only, no transposes.
    x_flat = x_nchw.reshape(N, C, HW)

    # --- training-mode BN batch stats: single-pass Pallas reduction ---
    stats = pl.pallas_call(
        _bn_stats_kernel,
        out_shape=jax.ShapeDtypeStruct((C, 2), jnp.float32),
        grid=(N,),
        in_specs=[pl.BlockSpec((1, C, HW), lambda n: (n, 0, 0))],
        out_specs=pl.BlockSpec((C, 2), lambda n: (0, 0)),
        compiler_params=pltpu.CompilerParams(
            dimension_semantics=("arbitrary",)),
    )(x_flat)
    cnt = jnp.float32(N * HW)
    mean = stats[:, 0] / cnt
    var = stats[:, 1] / cnt - mean * mean     # biased, like PyTorch BN normalization
    scale = gamma.astype(jnp.float32) * jax.lax.rsqrt(var + eps)
    bias = beta.astype(jnp.float32) - mean * scale

    # --- 3x3 taps stacked along the contraction dim: (Cout, 9*C) bf16 ---
    # w2[o, k*C + c] = conv_w[o, c, ky, kx]   with k = ky*3 + kx
    w2 = jnp.transpose(conv_w.astype(jnp.bfloat16).reshape(Cout, C, 9),
                       (0, 2, 1)).reshape(Cout, 9 * C)

    # --- source-column validity masks (f32): [0] kills col W-1 (dx=-1 taps),
    #     [1] kills col 0 (dx=+1 taps) ---
    ww = jnp.arange(HW, dtype=jnp.int32) % W
    src_masks = jnp.stack([ww != (W - 1), ww != 0]).astype(jnp.float32)  # (2, HW)

    kernel = functools.partial(_single_layer_kernel, H=H, W=W)
    out_flat = pl.pallas_call(
        kernel,
        out_shape=jax.ShapeDtypeStruct((N, C + Cout, HW), jnp.float32),
        grid=(N,),
        in_specs=[
            pl.BlockSpec((1, C, HW), lambda n: (n, 0, 0)),      # x, one image
            pl.BlockSpec((Cout, 9 * C), lambda n: (0, 0)),      # stacked taps (bf16)
            pl.BlockSpec((C, 1), lambda n: (0, 0)),             # BN scale
            pl.BlockSpec((C, 1), lambda n: (0, 0)),             # BN bias
            pl.BlockSpec((2, HW), lambda n: (0, 0)),            # source col masks
        ],
        out_specs=pl.BlockSpec((1, C + Cout, HW), lambda n: (n, 0, 0)),
        scratch_shapes=[pltpu.SemaphoreType.DMA(())],
        compiler_params=pltpu.CompilerParams(
            dimension_semantics=("parallel",),
            vmem_limit_bytes=64 * 1024 * 1024),
    )(x_flat, w2, scale.reshape(C, 1), bias.reshape(C, 1), src_masks)

    return out_flat.reshape(N, C + Cout, H, W)


def single_layer_reference(x, conv_w, gamma, beta, eps=1e-5):
    """Pure-JAX replica of the PyTorch forward (training-mode BN)."""
    mean = x.mean(axis=(0, 2, 3), keepdims=True)
    var = x.var(axis=(0, 2, 3), keepdims=True)
    xn = (x - mean) / jnp.sqrt(var + eps)
    xn = xn * gamma[None, :, None, None] + beta[None, :, None, None]
    z = jnp.maximum(xn, 0.0)
    y = jax.lax.conv_general_dilated(
        z, conv_w, window_strides=(1, 1), padding=((1, 1), (1, 1)),
        dimension_numbers=("NCHW", "OIHW", "NCHW"))
    return jnp.concatenate([x, y], axis=1)


if __name__ == "__main__":
    key = jax.random.PRNGKey(0)
    k1, k2 = jax.random.split(key)

    # Small shapes consistent with the module: NCHW input, 3x3 conv C->growth.
    N, C, H, W = 2, 4, 16, 16        # num_channels = 4
    growth_rate = 6

    x = jax.random.normal(k1, (N, C, H, W), dtype=jnp.float32)
    conv_w = jax.random.normal(
        k2, (growth_rate, C, 3, 3), dtype=jnp.float32) / jnp.sqrt(9.0 * C)
    gamma = jnp.ones((C,), dtype=jnp.float32)    # PyTorch BN default affine params
    beta = jnp.zeros((C,), dtype=jnp.float32)

    out = single_layer_forward(x, conv_w, gamma, beta)
    out = jax.block_until_ready(out)

    ref = single_layer_reference(x, conv_w, gamma, beta)
    assert out.shape == (N, C + growth_rate, H, W), out.shape
    max_err = float(jnp.max(jnp.abs(out - ref)))
    # bf16 MXU operands with f32 accumulation -> a few 1e-3 of absolute error.
    assert jnp.allclose(out, ref, rtol=2e-2, atol=2e-2), max_err
    print("KERNEL_OK")
</pallas_src>

<mosaic_0001>
module attributes {stable_mosaic.version = 11 : i64} {
  func.func @_bn_stats_kernel(%arg0: i32, %arg1: memref<1x4x256xf32, #tpu.memory_space<vmem>>, %arg2: memref<4x2xf32, #tpu.memory_space<vmem>>) attributes {dimension_semantics = [#tpu.dimension_semantics<arbitrary>], iteration_bounds = array<i64: 2>, scalar_prefetch = 0 : i64, scratch_operands = 0 : i64, tpu.core_type = #tpu.core_type<tc>, window_params = [{transform_indices = @transform_0, window_bounds = array<i64: 1, 4, 256>}, {pipeline_mode = #tpu.pipeline_mode<synchronous>, transform_indices = @transform_1, window_bounds = array<i64: 4, 2>}]} {
    %c0_i32 = arith.constant 0 : i32
    %0 = arith.cmpi eq, %arg0, %c0_i32 : i32
    %1 = arith.extui %0 : i1 to i32
    %c0_i32_0 = arith.constant 0 : i32
    %2 = arith.cmpi ne, %1, %c0_i32_0 : i32
    scf.if %2 {
      %cst_11 = arith.constant 0.000000e+00 : f32
      %16 = vector.broadcast %cst_11 : f32 to vector<4x2xf32>
      %c0_12 = arith.constant 0 : index
      %c0_13 = arith.constant 0 : index
      %17 = vector.load %arg2[%c0_12, %c0_13] : memref<4x2xf32, #tpu.memory_space<vmem>>, vector<4x2xf32>
      tpu.vector_store %arg2[%c0_12, %c0_13], %16 {strides = array<i32>} : memref<4x2xf32, #tpu.memory_space<vmem>>, vector<4x2xf32>,
    } else {
    }
    %c0 = arith.constant 0 : index
    %c0_1 = arith.constant 0 : index
    %c0_2 = arith.constant 0 : index
    %3 = vector.load %arg1[%c0, %c0_1, %c0_2] : memref<1x4x256xf32, #tpu.memory_space<vmem>>, vector<1x4x256xf32>
    %4 = vector.shape_cast %3 : vector<1x4x256xf32> to vector<4x256xf32>
    %cst = arith.constant dense<0.000000e+00> : vector<4xf32>
    %5 = vector.multi_reduction <add>, %4, %cst [1] : vector<4x256xf32> to vector<4xf32>
    %6 = vector.shape_cast %5 : vector<4xf32> to vector<4x1xf32>
    %7 = arith.mulf %4, %4 : vector<4x256xf32>
    %cst_3 = arith.constant dense<0.000000e+00> : vector<4xf32>
    %8 = vector.multi_reduction <add>, %7, %cst_3 [1] : vector<4x256xf32> to vector<4xf32>
    %9 = vector.shape_cast %8 : vector<4xf32> to vector<4x1xf32>
    %c0_4 = arith.constant 0 : index
    %c0_5 = arith.constant 0 : index
    %10 = vector.load %arg2[%c0_4, %c0_5] : memref<4x2xf32, #tpu.memory_space<vmem>>, vector<4x1xf32>
    %11 = arith.addf %10, %6 : vector<4x1xf32>
    %c0_6 = arith.constant 0 : index
    %c0_7 = arith.constant 0 : index
    %12 = vector.load %arg2[%c0_6, %c0_7] : memref<4x2xf32, #tpu.memory_space<vmem>>, vector<4x1xf32>
    tpu.vector_store %arg2[%c0_6, %c0_7], %11 {strides = array<i32>} : memref<4x2xf32, #tpu.memory_space<vmem>>, vector<4x1xf32>,
    %c0_8 = arith.constant 0 : index
    %c1 = arith.constant 1 : index
    %13 = vector.load %arg2[%c0_8, %c1] : memref<4x2xf32, #tpu.memory_space<vmem>>, vector<4x1xf32>
    %14 = arith.addf %13, %9 : vector<4x1xf32>
    %c0_9 = arith.constant 0 : index
    %c1_10 = arith.constant 1 : index
    %15 = vector.load %arg2[%c0_9, %c1_10] : memref<4x2xf32, #tpu.memory_space<vmem>>, vector<4x1xf32>
    tpu.vector_store %arg2[%c0_9, %c1_10], %14 {strides = array<i32>} : memref<4x2xf32, #tpu.memory_space<vmem>>, vector<4x1xf32>,
    return
  }
  func.func @transform_0(%arg0: i32) -> (i32, i32, i32) {
    %c0_i32 = arith.constant 0 : i32
    %c0_i32_0 = arith.constant 0 : i32
    %c0_i32_1 = arith.constant 0 : i32
    return %arg0, %c0_i32, %c0_i32_0 : i32, i32, i32
  }
  func.func @transform_1(%arg0: i32) -> (i32, i32) {
    %c0_i32 = arith.constant 0 : i32
    %c0_i32_0 = arith.constant 0 : i32
    %c0_i32_1 = arith.constant 0 : i32
    return %c0_i32, %c0_i32_0 : i32, i32
  }
}

</mosaic_0001>

<bundles_post_ra>
// kernel: tpu_custom_call.1
= control target key start
LH: loop header
LB: loop body
LE: loop exit
PB: predicated region body
PF: predicated region fallthrough
CT: control target
= control target key end

     0   :  { %6 = vsyncpa [#allocation3], 0  ;;  %s441_s0 = inlined_call_operand.hbm [shape: f32[2,4,256], index: 0, kind: input, shape index: {}]   ;;  %s442_s1 = inlined_call_operand.vmem [shape: f32[4,2], index: 1, kind: output, shape index: {}]  }
   0x1   :  { %8 = vsyncpa [#allocation3 + $0x1], 0  ;;  %s323_s6 = smov 0   ;;  %s325_s7 = smov 0  }
   0x2   :  { %s327_s8 = smov 0   ;;  %s329_s9 = smov 0  }
   0x3 LB: > { %s192_s10 = sadd.s32 4294967295, %s309_s9   ;;  %s343_s11 = sadd.s32 1, %s309_s9   ;;  %s309_s9 = sphi %s329_s9, %s450_s9   ;;  %s305_s8 = sphi %s327_s8, %s449_s8   ;;  %s301_s7 = sphi %s325_s7, %s448_s7   ;;  %s297_s6 = sphi %s323_s6, %s447_s6  }
   0x4   : > { %s18_s12 = ssub.s32 %s309_s9, %s343_s11  ;;  %s21_s13 = sadd.s32 1, %s305_s8 }
   0x5   : > { %p19_p0 = scmp.eq.s32.totalorder %s18_s12, 0  ;;  %p28_p1 = scmp.ne.s32.totalorder %s305_s8, %s301_s7 }
   0x6   : > { %p29_p2 = scmp.eq.s32.totalorder %s309_s9, 0  ;;  %p34_p3 = scmp.ne.s32.totalorder %s301_s7, %s297_s6 }
   0x7   : > { %s353_s14 = scalar_select %p19_p0, %s305_s8, %s21_s13  }
   0x8   : > { %p30_p4 = por %p29_p2, %p28_p1  ;;  %p35_p5 = scmp.eq.s32.totalorder %s192_s10, 0 }
   0x9   : > { %p210_p6 = scmp.lt.s32.totalorder %s309_s9, 2  ;;  %s79_s16 = sand.u32 1, %s305_s8  }
   0xa   : > { %p358_p7 = por %p35_p5, %p34_p3  ;;  %s195_s17 = sshll.u32 %s79_s16, 3 }
   0xb   : > { %s203_s18 = sshll.u32 %s309_s9, 7  ;;  %s83_s22 = scalar_lea.vmem [#allocation2], %s195_s17 }
   0xc   : > { %s367_s21 = scalar_lea.hbm %s441_s0, %s203_s18  ;;  %s91_s23 = sshll.u32 %s83_s22, 4  ;;  %s369_s23 = int_to_ptr.vmem [resolvable:$true] %s91_s23 }
   0xd   : > { %p371_p8 = pnand %p210_p6, %p30_p4  ;;  %s80_s25 = scalar_lea.sflag [#allocation3], %s79_s16 }
   0xe   : > { %s245_s26 = scalar_lea.hbm %s367_s21, 128  ;;  %s250_s29 = scalar_lea.hbm %s441_s0, 256 }
   0xf   : > { %p246_p11 = scmp.ne.s32.totalorder %s367_s21, %s245_s26  ;;  %p247_p12 = pneg %p371_p8 }
  0x10   : > { %p251_p1 = scmp.lt.u32.totalorder %s367_s21, %s441_s0  ;;  %p252_p2 = scmp.lt.u32.totalorder %s250_s29, %s245_s26 }
  0x11   : > { %p248_p13 = pnand %p247_p12, %p246_p11  ;;  %p254_p4 = scmp.lt.u32.totalorder %s245_s26, %s367_s21 }
  0x12   : > { %p253_p3 = por %p252_p2, %p251_p1 }
  0x13   : > { %p249_p0 = pneg %p248_p13 }
  0x14   : > { %p255_p5 = por %p254_p4, %p253_p3 }
  0x16   : > { %p256_p6 = pnand %p255_p5, %p249_p0 }
  0x18   : > { %259 = shalt.err (!%p256_p6)
}
  0x19   : > { %s260_s3 = scalar_lea.vmem %s369_s23, 128  ;;  %s311_s4 = smov [#allocation2]  }
  0x1a   : > { %p261_p11 = scmp.ne.s32.totalorder %s369_s23, %s260_s3  ;;  %s265_s5 = sshll.u32 %s311_s4, 4  ;;  %s266_s5 = int_to_ptr.vmem [resolvable:$false] %s265_s5 }
  0x1b   : > { %s267_s6 = scalar_lea.vmem %s266_s5, 256  ;;  %p268_p10 = scmp.lt.s32.totalorder %s369_s23, %s266_s5 }
  0x1c   : > { %p263_p13 = pnand %p261_p11, %p247_p12  ;;  %p269_p1 = scmp.lt.s32.totalorder %s267_s6, %s260_s3 }
  0x1e   : > { %p264_p9 = pneg %p263_p13  ;;  %p270_p2 = por %p269_p1, %p268_p10 }
  0x20   : > { %p271_p3 = pnand %p270_p2, %p264_p9 }
  0x22   : > { %274 = shalt.err (!%p271_p3)
}
  0x23   : > { %209 = dma.hbm_to_vmem [thread:$0]  (!%p371_p8), %s367_s21, 128, %s369_s23, %s80_s25  }
  0x24   : > { %p445_p0 = scmp.lt.s32.totalorder %s309_s9, 3  ;;  %p446_p4 = scmp.ge.s32.totalorder %s309_s9, 1 }
  0x26   : > { %p97_p12 = pnand %p446_p4, %p445_p0 }
  0x27   : > { %s102_s12 = sand.u32 (!%p97_p12), 1, %s301_s7  }
  0x28   : > { %100 = sbr.rel (%p97_p12) target bundleno = 218 (0xda), region = 24  ;;  %s199_s13 = sshll.u32 (!%p97_p12), %s102_s12, 3 }
  0x29   : > { %s103_s16 = scalar_lea.sflag (!%p97_p12), [#allocation3], %s102_s12  ;;  %s106_s17 = scalar_lea.vmem (!%p97_p12), [#allocation2], %s199_s13 }
  0x2f   : > { %292 = dma.done.wait (%p358_p7), %s103_s16, 128  }
  0x30   : > { %294 = vsyncadd (%p358_p7), %s103_s16, 4294967168  ;;  %p200_p9 = scmp.ne.s32.totalorder %s192_s10, 0 }
  0x31   : > { %vm124_vm0 = vcmask (!%p200_p9), 11264   ;;  %v312_v0 = vmov (!%p200_p9), 0.0  }
  0x32   : > { %123 = sbr.rel (%p200_p9) target bundleno = 57 (0x39), region = 32  ;;  %125 = vst.msk [vmem:[%s442_s1] sm:$0xf] (!%p200_p9), %vm124_vm0, %v312_v0 }
  0x39 PF: > { %v126_v1 = vld [vmem:[%s106_s17] sm:$0xff]  ;;  %vm130_vm1 = vcmask 1043456   ;;  %vm147_vm2 = vcmask 3072   ;;  %vm151_vm3 = vcmask 11272  }
  0x3a   : > { %v128_v2 = vcombine.high %v126_v1, %v126_v1  ;;  %v131_v3 = vsel %vm130_vm1, %v126_v1, 0.0  ;;  %v136_v4 = vmul.f32 %v126_v1, %v126_v1  ;;  %v145_v11 = vld [vmem:[%s442_s1] sm:$0xf] }
  0x3c   : > { %v132_v5 = vsel %vm130_vm1, %v128_v2, 0.0  ;;  %v138_v6 = vcombine.high %v136_v4, %v136_v4  ;;  %v140_v7 = vsel %vm130_vm1, %v136_v4, 0.0 }
  0x3d   : > { %v133_v8 = vadd.f32 %v132_v5, %v131_v3 }
  0x3e   : > { %v141_v9 = vsel %vm130_vm1, %v138_v6, 0.0 }
  0x3f   : > { %134 = vadd.xlane.f32.xlu0 %v133_v8  ;;  %v142_v10 = vadd.f32 %v141_v9, %v140_v7 }
  0x43   : > { %143 = vadd.xlane.f32.xlu0 %v142_v10 }
  0xcc   : > { %v135_v12 = vpop.xlane.xlu0 %134 }
  0xcd   : > { %v146_v13 = vadd.f32 %v145_v11, %v135_v12 }
  0xcf   : > { %148 = vst.msk [vmem:[%s442_s1] sm:$0xf] %vm147_vm2, %v146_v13 }
  0xd0   : > { %v144_v14 = vpop.xlane.xlu0 %143 }
  0xd6   : > { %v149_v15 = vld [vmem:[%s442_s1] sm:$0xf] }
  0xd7   : > { %v150_v16 = vadd.f32 %v149_v15, %v144_v14 }
  0xd9   : > { %152 = vst.msk [vmem:[%s442_s1] sm:$0xf] %vm151_vm3, %v150_v16 }
  0xda PF: > { %p11_p7 = scmp.ge.s32.totalorder %s343_s11, 4   ;;  %s447_s6 = smov %s301_s7 }
  0xdb   : > { %s448_s7 = smov %s305_s8  ;;  %s449_s8 = smov %s353_s14 }
  0xdc   : > { %s450_s9 = smov %s343_s11  ;;  %13 = sbr.rel (!%p11_p7) target bundleno = 3 (0x3), region = 64 }
  0xe3   :  { %164 = vsyncpa [#allocation3], 1 }
  0xe4   :  { %166 = vsyncpa [#allocation3 + $0x1], 1 }

</bundles_post_ra>
